<compile_context>
chip_gen: v7x
topology: tpu7x:2x2x1
jax: 0.10.0
libtpu: 0.0.40
codegen_flags: <defaults>
</compile_context>

<pallas_src>
import jax
import jax.numpy as jnp
from jax.experimental import pallas as pl
from jax.experimental.pallas import tpu as pltpu

STATE_SIZE = 16
ACTION_SIZE = 8
HIDDEN = 64          # logical hidden width (matches nn.Linear(., 64))
HP = 128             # lane-padded hidden width
OUTP = 128           # lane-padded fc3 matmul width (only first 8 cols stored)

_TB_CAP = 1024       # default max rows per grid step (sweepable)
_MIN_SPLIT_ROWS = 512  # if B >= 2*this, force >=2 grid steps (v7x dual-TC)


def _round_up(n, m):
    return ((n + m - 1) // m) * m


def _cdiv(a, b):
    return -(-a // b)


def _choose_tile(B, tb_cap):
    """Adaptive batch tile: big enough to amortize per-step overhead, small
    enough that ragged batches waste <= one sublane group per step, and at
    least 2 steps for large batches so v7x's two TensorCores both get work."""
    n_steps = max(1, _cdiv(B, tb_cap))
    if B >= 2 * _MIN_SPLIT_ROWS:
        n_steps = max(n_steps, 2)
    TB = _round_up(_cdiv(B, n_steps), 8)   # f32 sublane multiple
    Bp = TB * n_steps
    return TB, Bp, n_steps


def dqn_kernel(x_ref, w1_ref, w23_ref, b_ref, o_ref):
    # Load activations in bf16 for the MXU; accumulate in f32.
    x = x_ref[...].astype(jnp.bfloat16)                    # (TB, 16)
    w1 = w1_ref[...]                                       # (16, 128) bf16
    w2 = w23_ref[:, :HP]                                   # (128, 128) bf16 (static, lane-aligned)
    w3 = w23_ref[:, HP:]                                   # (128, 128) bf16
    b1 = b_ref[:, :HP]                                     # (1, 128) f32
    b2 = b_ref[:, HP:2 * HP]
    b3 = b_ref[:, 2 * HP:]

    # fc1 + relu (f32 accumulation, f32 elementwise)
    h1 = jnp.dot(x, w1, preferred_element_type=jnp.float32)
    h1 = jnp.maximum(h1 + b1, 0.0)
    # fc2 + relu
    h2 = jnp.dot(h1.astype(jnp.bfloat16), w2, preferred_element_type=jnp.float32)
    h2 = jnp.maximum(h2 + b2, 0.0)
    # fc3 (no activation); padded weight columns are exactly zero by construction
    out = jnp.dot(h2.astype(jnp.bfloat16), w3, preferred_element_type=jnp.float32) + b3
    # Store only the real action columns -> 32 B/row writeback instead of 512 B/row.
    o_ref[...] = out[:, :ACTION_SIZE].astype(o_ref.dtype)


def dqn_forward(x, params, tb=_TB_CAP):
    """x: (B, STATE_SIZE) f32. Returns (B, ACTION_SIZE) f32."""
    B = x.shape[0]
    TB, Bp, n_steps = _choose_tile(B, tb)
    if Bp != B:
        x = jnp.pad(x, ((0, Bp - B), (0, 0)))

    flops = 2 * Bp * (STATE_SIZE * HP + HP * HP + HP * OUTP)
    bytes_accessed = (Bp * STATE_SIZE * 4            # x (f32)
                      + params["w1"].size * 2        # bf16 weights
                      + params["w23"].size * 2
                      + params["b"].size * 4         # f32 biases
                      + Bp * ACTION_SIZE * 4)        # narrow f32 output

    out = pl.pallas_call(
        dqn_kernel,
        out_shape=jax.ShapeDtypeStruct((Bp, ACTION_SIZE), jnp.float32),
        grid=(n_steps,),
        in_specs=[
            pl.BlockSpec((TB, STATE_SIZE), lambda i: (i, 0)),     # batch-tiled x
            pl.BlockSpec((STATE_SIZE, HP), lambda i: (0, 0)),     # resident w1
            pl.BlockSpec((HP, 2 * HP), lambda i: (0, 0)),         # resident w2|w3
            pl.BlockSpec((1, 3 * HP), lambda i: (0, 0)),          # resident biases
        ],
        out_specs=pl.BlockSpec((TB, ACTION_SIZE), lambda i: (i, 0)),  # narrow out
        compiler_params=pltpu.CompilerParams(
            dimension_semantics=("parallel",)),                   # v7x: 2 TCs share batch
        cost_estimate=pl.CostEstimate(
            flops=flops, transcendentals=0, bytes_accessed=bytes_accessed),
    )(x, params["w1"], params["w23"], params["b"])

    return out[:B] if Bp != B else out


def init_params(key):
    """Matches nn.Linear default init U(-1/sqrt(fan_in), 1/sqrt(fan_in)) on the
    valid (unpadded) region; padding is zero so padded lanes contribute nothing.
    Weights stored pre-transposed to (in, out), lane-padded, and pre-cast to bf16.
    Biases packed into one (1, 384) f32 row: [b1 | b2 | b3]."""
    def linear(k, fan_in, fan_out):
        kw, kb = jax.random.split(k)
        bound = 1.0 / jnp.sqrt(jnp.float32(fan_in))
        w = jax.random.uniform(kw, (fan_in, fan_out), jnp.float32, -bound, bound)
        b = jax.random.uniform(kb, (fan_out,), jnp.float32, -bound, bound)
        return w, b

    k1, k2, k3 = jax.random.split(key, 3)
    w1, b1 = linear(k1, STATE_SIZE, HIDDEN)
    w2, b2 = linear(k2, HIDDEN, HIDDEN)
    w3, b3 = linear(k3, HIDDEN, ACTION_SIZE)

    w1p = jnp.zeros((STATE_SIZE, HP), jnp.float32).at[:, :HIDDEN].set(w1)
    w2p = jnp.zeros((HP, HP), jnp.float32).at[:HIDDEN, :HIDDEN].set(w2)
    w3p = jnp.zeros((HP, OUTP), jnp.float32).at[:HIDDEN, :ACTION_SIZE].set(w3)
    b1p = jnp.zeros((HP,), jnp.float32).at[:HIDDEN].set(b1)
    b2p = jnp.zeros((HP,), jnp.float32).at[:HIDDEN].set(b2)
    b3p = jnp.zeros((OUTP,), jnp.float32).at[:ACTION_SIZE].set(b3)

    return {
        "w1": w1p.astype(jnp.bfloat16),
        "w23": jnp.concatenate([w2p, w3p], axis=1).astype(jnp.bfloat16),  # (128, 256)
        "b": jnp.concatenate([b1p, b2p, b3p])[None, :],                   # (1, 384) f32
    }


def dqn_reference(x, p):
    """Pure-JAX reference using the same (bf16-rounded) weights in f32 math.
    Note: the kernel also rounds activations to bf16 before each matmul, so it
    is not bit-parity with a float32 PyTorch forward (fine for DQN Q-values)."""
    w1 = p["w1"].astype(jnp.float32)
    w2 = p["w23"][:, :HP].astype(jnp.float32)
    w3 = p["w23"][:, HP:].astype(jnp.float32)
    b1 = p["b"][:, :HP]
    b2 = p["b"][:, HP:2 * HP]
    b3 = p["b"][:, 2 * HP:]
    h1 = jnp.maximum(x @ w1 + b1, 0.0)
    h2 = jnp.maximum(h1 @ w2 + b2, 0.0)
    return (h2 @ w3 + b3)[:, :ACTION_SIZE]


if __name__ == "__main__":
    key = jax.random.PRNGKey(0)
    kx, kp = jax.random.split(key)
    params = init_params(kp)

    # small-batch path (single grid step, TB rounded to a sublane multiple)
    x = jax.random.normal(kx, (8, STATE_SIZE), jnp.float32)
    out = jax.block_until_ready(dqn_forward(x, params))
    ref = dqn_reference(x, params)
    assert out.shape == (8, ACTION_SIZE)
    assert jnp.allclose(out, ref, atol=5e-2, rtol=5e-2), "mismatch (small batch)"

    # ragged batch: B=300 -> adaptive TB=304, grid=(1,), only 4 padded rows
    x_big = jax.random.normal(kx, (300, STATE_SIZE), jnp.float32)
    out_big = jax.block_until_ready(dqn_forward(x_big, params))
    ref_big = dqn_reference(x_big, params)
    assert out_big.shape == (300, ACTION_SIZE)
    assert jnp.allclose(out_big, ref_big, atol=5e-2, rtol=5e-2), "mismatch (ragged batch)"

    # large batch: B=2500 -> >=2 grid steps (v7x dual-TC path), TB=840, grid=(3,)
    x_huge = jax.random.normal(kx, (2500, STATE_SIZE), jnp.float32)
    out_huge = jax.block_until_ready(dqn_forward(x_huge, params))
    ref_huge = dqn_reference(x_huge, params)
    assert out_huge.shape == (2500, ACTION_SIZE)
    assert jnp.allclose(out_huge, ref_huge, atol=5e-2, rtol=5e-2), "mismatch (large batch)"

    print("KERNEL_OK")
</pallas_src>

<mosaic_0001>
module attributes {stable_mosaic.version = 11 : i64} {
  func.func @dqn_kernel(%arg0: i32, %arg1: memref<8x16xf32, #tpu.memory_space<vmem>>, %arg2: memref<16x128xbf16, #tpu.memory_space<vmem>>, %arg3: memref<128x256xbf16, #tpu.memory_space<vmem>>, %arg4: memref<1x384xf32, #tpu.memory_space<vmem>>, %arg5: memref<8x8xf32, #tpu.memory_space<vmem>>) attributes {dimension_semantics = [#tpu.dimension_semantics<parallel>], iteration_bounds = array<i64: 1>, scalar_prefetch = 0 : i64, scratch_operands = 0 : i64, tpu.core_type = #tpu.core_type<tc>, window_params = [{transform_indices = @transform_0, window_bounds = array<i64: 8, 16>}, {pipeline_mode = #tpu.pipeline_mode<synchronous>, transform_indices = @transform_1, window_bounds = array<i64: 16, 128>}, {pipeline_mode = #tpu.pipeline_mode<synchronous>, transform_indices = @transform_2, window_bounds = array<i64: 128, 256>}, {pipeline_mode = #tpu.pipeline_mode<synchronous>, transform_indices = @transform_3, window_bounds = array<i64: 1, 384>}, {transform_indices = @transform_4, window_bounds = array<i64: 8, 8>}]} {
    %c0 = arith.constant 0 : index
    %c0_0 = arith.constant 0 : index
    %0 = vector.load %arg1[%c0, %c0_0] : memref<8x16xf32, #tpu.memory_space<vmem>>, vector<8x16xf32>
    %1 = arith.truncf %0 : vector<8x16xf32> to vector<8x16xbf16>
    %c0_1 = arith.constant 0 : index
    %c0_2 = arith.constant 0 : index
    %2 = vector.load %arg2[%c0_1, %c0_2] : memref<16x128xbf16, #tpu.memory_space<vmem>>, vector<16x128xbf16>
    %c0_3 = arith.constant 0 : index
    %c0_4 = arith.constant 0 : index
    %3 = vector.load %arg3[%c0_3, %c0_4] : memref<128x256xbf16, #tpu.memory_space<vmem>>, vector<128x128xbf16>
    %c0_5 = arith.constant 0 : index
    %c128 = arith.constant 128 : index
    %4 = vector.load %arg3[%c0_5, %c128] : memref<128x256xbf16, #tpu.memory_space<vmem>>, vector<128x128xbf16>
    %c0_6 = arith.constant 0 : index
    %c0_7 = arith.constant 0 : index
    %5 = vector.load %arg4[%c0_6, %c0_7] : memref<1x384xf32, #tpu.memory_space<vmem>>, vector<1x128xf32>
    %c0_8 = arith.constant 0 : index
    %c128_9 = arith.constant 128 : index
    %6 = vector.load %arg4[%c0_8, %c128_9] : memref<1x384xf32, #tpu.memory_space<vmem>>, vector<1x128xf32>
    %c0_10 = arith.constant 0 : index
    %c256 = arith.constant 256 : index
    %7 = vector.load %arg4[%c0_10, %c256] : memref<1x384xf32, #tpu.memory_space<vmem>>, vector<1x128xf32>
    %cst = arith.constant dense<0.000000e+00> : vector<8x128xf32>
    %8 = tpu.matmul %1, %2, %cst {dimension_numbers = #tpu.dot_dimension_numbers<[1], [0], [0], [1], [0, 0, 1, 1], [], []>} : vector<8x16xbf16>, vector<16x128xbf16>, vector<8x128xf32> -> vector<8x128xf32>
    %9 = vector.broadcast %5 : vector<1x128xf32> to vector<8x128xf32>
    %10 = arith.addf %8, %9 : vector<8x128xf32>
    %cst_11 = arith.constant 0.000000e+00 : f32
    %11 = vector.broadcast %cst_11 : f32 to vector<8x128xf32>
    %12 = arith.maximumf %10, %11 : vector<8x128xf32>
    %13 = arith.truncf %12 : vector<8x128xf32> to vector<8x128xbf16>
    %cst_12 = arith.constant dense<0.000000e+00> : vector<8x128xf32>
    %14 = tpu.matmul %13, %3, %cst_12 {dimension_numbers = #tpu.dot_dimension_numbers<[1], [0], [0], [1], [0, 0, 1, 1], [], []>} : vector<8x128xbf16>, vector<128x128xbf16>, vector<8x128xf32> -> vector<8x128xf32>
    %15 = vector.broadcast %6 : vector<1x128xf32> to vector<8x128xf32>
    %16 = arith.addf %14, %15 : vector<8x128xf32>
    %cst_13 = arith.constant 0.000000e+00 : f32
    %17 = vector.broadcast %cst_13 : f32 to vector<8x128xf32>
    %18 = arith.maximumf %16, %17 : vector<8x128xf32>
    %19 = arith.truncf %18 : vector<8x128xf32> to vector<8x128xbf16>
    %cst_14 = arith.constant dense<0.000000e+00> : vector<8x128xf32>
    %20 = tpu.matmul %19, %4, %cst_14 {dimension_numbers = #tpu.dot_dimension_numbers<[1], [0], [0], [1], [0, 0, 1, 1], [], []>} : vector<8x128xbf16>, vector<128x128xbf16>, vector<8x128xf32> -> vector<8x128xf32>
    %21 = vector.broadcast %7 : vector<1x128xf32> to vector<8x128xf32>
    %22 = arith.addf %20, %21 : vector<8x128xf32>
    %23 = vector.extract_strided_slice %22 {offsets = [0, 0], sizes = [8, 8], strides = [1, 1]} : vector<8x128xf32> to vector<8x8xf32>
    %c0_15 = arith.constant 0 : index
    %c0_16 = arith.constant 0 : index
    %24 = vector.load %arg5[%c0_15, %c0_16] : memref<8x8xf32, #tpu.memory_space<vmem>>, vector<8x8xf32>
    tpu.vector_store %arg5[%c0_15, %c0_16], %23 {strides = array<i32>} : memref<8x8xf32, #tpu.memory_space<vmem>>, vector<8x8xf32>,
    return
  }
  func.func @transform_0(%arg0: i32) -> (i32, i32) {
    %c0_i32 = arith.constant 0 : i32
    %c0_i32_0 = arith.constant 0 : i32
    return %arg0, %c0_i32 : i32, i32
  }
  func.func @transform_1(%arg0: i32) -> (i32, i32) {
    %c0_i32 = arith.constant 0 : i32
    %c0_i32_0 = arith.constant 0 : i32
    %c0_i32_1 = arith.constant 0 : i32
    return %c0_i32, %c0_i32_0 : i32, i32
  }
  func.func @transform_2(%arg0: i32) -> (i32, i32) {
    %c0_i32 = arith.constant 0 : i32
    %c0_i32_0 = arith.constant 0 : i32
    %c0_i32_1 = arith.constant 0 : i32
    return %c0_i32, %c0_i32_0 : i32, i32
  }
  func.func @transform_3(%arg0: i32) -> (i32, i32) {
    %c0_i32 = arith.constant 0 : i32
    %c0_i32_0 = arith.constant 0 : i32
    %c0_i32_1 = arith.constant 0 : i32
    return %c0_i32, %c0_i32_0 : i32, i32
  }
  func.func @transform_4(%arg0: i32) -> (i32, i32) {
    %c0_i32 = arith.constant 0 : i32
    %c0_i32_0 = arith.constant 0 : i32
    return %arg0, %c0_i32 : i32, i32
  }
}

</mosaic_0001>

<bundles_post_ra>
// kernel: tpu_custom_call.1
= control target key start
LH: loop header
LB: loop body
LE: loop exit
PB: predicated region body
PF: predicated region fallthrough
CT: control target
= control target key end

     0   :  { %9 = vsyncpa [#allocation3], 0  ;;  %s683_s0 = inlined_call_operand.hbm [shape: f32[8,16], index: 0, kind: input, shape index: {}]   ;;  %s684_s1 = inlined_call_operand.hbm [shape: bf16[16,128], index: 1, kind: input, shape index: {}]   ;;  %s685_s2 = inlined_call_operand.hbm [shape: bf16[128,256], index: 2, kind: input, shape index: {}]   ;;  %s686_s3 = inlined_call_operand.vmem [shape: f32[1,384], index: 3, kind: input, shape index: {}]   ;;  %s687_s4 = inlined_call_operand.hbm [shape: f32[8,8], index: 4, kind: output, shape index: {}]  }
   0x1   :  { %10 = vsyncpa [#allocation6], 0 }
   0x2   :  { %11 = vsyncpa [#allocation4], 0  ;;  %s571_s15 = smov [#allocation5]   ;;  %s477_s19 = scalar_lea.hbm %s684_s1, 128 }
   0x3   :  { %s27_s16 = sshll.u32 %s571_s15, 4  ;;  %p478_p0 = scmp.ne.s32.totalorder %s684_s1, %s477_s19  ;;  %s28_s16 = int_to_ptr.vmem [resolvable:$true] %s27_s16 }
   0x4   :  { %p481_p1 = scmp.lt.u32.totalorder %s477_s19, %s684_s1 }
   0x6   :  { %p483_p2 = pnand %p481_p1, %p478_p0 }
   0x8   :  { %486 = shalt.err (!%p483_p2)
}
   0x9   :  { %s487_s24 = scalar_lea.vmem %s28_s16, 128  ;;  %p492_p4 = scmp.lt.s32.totalorder %s28_s16, %s28_s16 }
   0xa   :  { %p488_p3 = scmp.ne.s32.totalorder %s28_s16, %s487_s24  ;;  %p493_p5 = scmp.lt.s32.totalorder %s487_s24, %s487_s24 }
   0xc   :  { %p494_p6 = por %p493_p5, %p492_p4 }
   0xe   :  { %p495_p7 = pnand %p494_p6, %p488_p3 }
  0x10   :  { %498 = shalt.err (!%p495_p7)
}
  0x11   :  { %s572_s25 = smov 64   ;;  %s573_s26 = smov 4  }
  0x12   :  { %33 = dma.hbm_to_vmem [thread:$0]  %s684_s1, 128, %s28_s16, [#allocation6], %s572_s25, %s572_s25, %s573_s26  }
  0x13   :  { %s574_s29 = smov [#allocation2]   ;;  %s575_s5 = smov [#allocation7]  }
  0x14   :  { %s18_s30 = sshll.u32 %s574_s29, 4  ;;  %s39_s6 = sshll.u32 %s575_s5, 4  ;;  %s19_s30 = int_to_ptr.vmem [resolvable:$true] %s18_s30  ;;  %s40_s6 = int_to_ptr.vmem [resolvable:$true] %s39_s6 }
  0x15   :  { %s499_s9 = scalar_lea.hbm %s683_s0, 128 }
  0x16   :  { %p500_p8 = scmp.ne.s32.totalorder %s683_s0, %s499_s9  ;;  %p503_p9 = scmp.lt.u32.totalorder %s499_s9, %s683_s0 }
  0x18   :  { %p505_p10 = pnand %p503_p9, %p500_p8 }
  0x1a   :  { %508 = shalt.err (!%p505_p10)
}
  0x1b   :  { %s509_s1 = scalar_lea.vmem %s19_s30, 128  ;;  %p514_p12 = scmp.lt.s32.totalorder %s19_s30, %s19_s30 }
  0x1c   :  { %p510_p11 = scmp.ne.s32.totalorder %s19_s30, %s509_s1  ;;  %p515_p13 = scmp.lt.s32.totalorder %s509_s1, %s509_s1 }
  0x1e   :  { %p516_p0 = por %p515_p13, %p514_p12 }
  0x20   :  { %p517_p1 = pnand %p516_p0, %p510_p11 }
  0x22   :  { %520 = shalt.err (!%p517_p1)
}
  0x23   :  { %21 = dma.hbm_to_vmem [thread:$0]  %s683_s0, 128, %s19_s30, [#allocation3]  }
  0x24   :  { %s521_s18 = scalar_lea.hbm %s685_s2, 2048 }
  0x25   :  { %p522_p2 = scmp.ne.s32.totalorder %s685_s2, %s521_s18  ;;  %p525_p3 = scmp.lt.u32.totalorder %s521_s18, %s685_s2 }
  0x27   :  { %p527_p4 = pnand %p525_p3, %p522_p2 }
  0x29   :  { %530 = shalt.err (!%p527_p4)
}
  0x2a   :  { %s531_s23 = scalar_lea.vmem %s40_s6, 2048  ;;  %p536_p6 = scmp.lt.s32.totalorder %s40_s6, %s40_s6 }
  0x2b   :  { %p532_p5 = scmp.ne.s32.totalorder %s40_s6, %s531_s23  ;;  %p537_p7 = scmp.lt.s32.totalorder %s531_s23, %s531_s23 }
  0x2d   :  { %p538_p8 = por %p537_p7, %p536_p6 }
  0x2f   :  { %p539_p9 = pnand %p538_p8, %p532_p5 }
  0x31   :  { %542 = shalt.err (!%p539_p9)
}
  0x32   :  { %s576_s0 = smov 128   ;;  %s577_s24 = smov 8  }
  0x33   :  { %45 = dma.hbm_to_vmem [thread:$0]  %s685_s2, 2048, %s40_s6, [#allocation6], %s576_s0, %s576_s0, %s577_s24  }
  0x34   :  { %565 = dma.done.wait [#allocation3], 128  }
  0x35   :  { %566 = vsyncadd [#allocation3], 4294967168 }
  0x36   :  { %567 = dma.done.wait [#allocation6], 2176  }
  0x37   :  { %568 = vsyncadd [#allocation6], 4294965120  ;;  %v578_v0 = vmov 0.0   ;;  %vm579_vm0 = vmmov 0   ;;  %v460_v1 = vld [vmem:[#allocation5] sm:$0xff]   ;;  %v58_v2 = vld [vmem:[#allocation2] sm:$0xff] }
  0x38   :  { %404 = vmatprep.subr.bf16.mxu0 %v578_v0  ;;  %406 = vmatprep.mubr.msk.bf16.mxu0 %vm579_vm0, %v578_v0  ;;  %vm109_vm1 = vcmask 130048   ;;  %v59_v3 = vpack.c.bf16 %v58_v2, %v58_v2  ;;  %v461_v4 = vld [vmem:[#allocation7] ss:$8 sps:$4 sm:$0xff]   ;;  %v462_v5 = vld [vmem:[#allocation7 + $0x10] ss:$8 sps:$4 sm:$0xff]   ;;  %s580_s6 = smov [#allocation8]  }
  0x39   :  { %410 = vmatprep.subr.bf16.mxu1 %v578_v0  ;;  %426 = vmatprep.mubr.msk.bf16.mxu1 %vm579_vm0, %v578_v0  ;;  %v463_v6 = vld [vmem:[#allocation7 + $0x20] ss:$8 sps:$4 sm:$0xff]   ;;  %v464_v7 = vld [vmem:[#allocation7 + $0x30] ss:$8 sps:$4 sm:$0xff]   ;;  %v469_v12 = vld [vmem:[#allocation7 + $0x4] ss:$8 sps:$4 sm:$0xff]  }
  0x3a   :  { %405 = vmatpush3.bf16.msra.mxu0 %v460_v1  ;;  %411 = vmatpush3.bf16.msra.mxu1 %v461_v4  ;;  %v465_v8 = vld [vmem:[#allocation7 + $0x40] ss:$8 sps:$4 sm:$0xff]   ;;  %v466_v9 = vld [vmem:[#allocation7 + $0x50] ss:$8 sps:$4 sm:$0xff]   ;;  %v470_v13 = vld [vmem:[#allocation7 + $0x14] ss:$8 sps:$4 sm:$0xff]  }
  0x3b   :  { %430 = vmatprep.subr.bf16.mxu0 %v578_v0  ;;  %412 = vmatprep.subr.bf16.mxu1 %v578_v0  ;;  %v467_v10 = vld [vmem:[#allocation7 + $0x60] ss:$8 sps:$4 sm:$0xff]   ;;  %v468_v11 = vld [vmem:[#allocation7 + $0x70] ss:$8 sps:$4 sm:$0xff]   ;;  %v471_v14 = vld [vmem:[#allocation7 + $0x24] ss:$8 sps:$4 sm:$0xff]  }
  0x3c   :  { %v472_v15 = vld [vmem:[#allocation7 + $0x34] ss:$8 sps:$4 sm:$0xff]   ;;  %v473_v16 = vld [vmem:[#allocation7 + $0x44] ss:$8 sps:$4 sm:$0xff]   ;;  %v363_v18 = vld [vmem:[%s686_s3] ss:$0 sm:$0xff] }
  0x3d   :  { %407 = vmatmul.mubr.msk.bf16.vlgmr.msra.gmra.mrb[0].mxu0 %vm109_vm1, %v59_v3  ;;  %v474_v17 = vld [vmem:[#allocation7 + $0x54] ss:$8 sps:$4 sm:$0xff]   ;;  %v475_v26 = vld [vmem:[#allocation7 + $0x64] ss:$8 sps:$4 sm:$0xff]   ;;  %v366_v28 = vld [vmem:[%s686_s3 + $0x1] ss:$0 sm:$0xff] }
  0x3e   :  { %446 = vmatprep.mubr.msk.bf16.mxu0 %vm579_vm0, %v578_v0  ;;  %413 = vmatpush3.bf16.msra.mxu1 %v462_v5  ;;  %v476_v27 = vld [vmem:[#allocation7 + $0x74] ss:$8 sps:$4 sm:$0xff]   ;;  %v375_v36 = vld [vmem:[%s686_s3 + $0x2] ss:$0 sm:$0xff]  ;;  %s353_s7 = sshll.u32 %s580_s6, 4  ;;  %vm345_vm2 = vcmask 64512   ;;  %s354_s7 = int_to_ptr.vmem [resolvable:$true] %s353_s7 }
  0x3f   :  { %414 = vmatprep.subr.bf16.mxu1 %v578_v0  ;;  %431 = vmatpush3.bf16.msra.mxu0 %v469_v12  ;;  %s543_s8 = scalar_lea.vmem %s354_s7, 128  ;;  %p548_p11 = scmp.lt.s32.totalorder %s354_s7, %s354_s7 }
  0x40   :  { %432 = vmatprep.subr.bf16.mxu0 %v578_v0  ;;  %p544_p10 = scmp.ne.s32.totalorder %s354_s7, %s543_s8  ;;  %p549_p12 = scmp.lt.s32.totalorder %s543_s8, %s543_s8 }
  0x42   :  { %415 = vmatpush3.bf16.msra.mxu1 %v463_v6  ;;  %p550_p13 = por %p549_p12, %p548_p11 }
  0x43   :  { %416 = vmatprep.subr.bf16.mxu1 %v578_v0  ;;  %433 = vmatpush3.bf16.msra.mxu0 %v470_v13 }
  0x44   :  { %434 = vmatprep.subr.bf16.mxu0 %v578_v0  ;;  %p551_p0 = pnand %p550_p13, %p544_p10 }
  0x46   :  { %417 = vmatpush3.bf16.msra.mxu1 %v464_v7 }
  0x47   :  { %418 = vmatprep.subr.bf16.mxu1 %v578_v0  ;;  %435 = vmatpush3.bf16.msra.mxu0 %v471_v14 }
  0x48   :  { %436 = vmatprep.subr.bf16.mxu0 %v578_v0 }
  0x4a   :  { %419 = vmatpush3.bf16.msra.mxu1 %v465_v8 }
  0x4b   :  { %420 = vmatprep.subr.bf16.mxu1 %v578_v0  ;;  %437 = vmatpush3.bf16.msra.mxu0 %v472_v15 }
  0x4c   :  { %438 = vmatprep.subr.bf16.mxu0 %v578_v0 }
  0x4e   :  { %421 = vmatpush3.bf16.msra.mxu1 %v466_v9 }
  0x4f   :  { %422 = vmatprep.subr.bf16.mxu1 %v578_v0  ;;  %439 = vmatpush3.bf16.msra.mxu0 %v473_v16 }
  0x50   :  { %440 = vmatprep.subr.bf16.mxu0 %v578_v0 }
  0x52   :  { %423 = vmatpush3.bf16.msra.mxu1 %v467_v10 }
  0x53   :  { %424 = vmatprep.subr.bf16.mxu1 %v578_v0  ;;  %441 = vmatpush3.bf16.msra.mxu0 %v474_v17 }
  0x54   :  { %442 = vmatprep.subr.bf16.mxu0 %v578_v0 }
  0x56   :  { %425 = vmatpush3.bf16.msra.mxu1 %v468_v11 }
  0x57   :  { %443 = vmatpush3.bf16.msra.mxu0 %v475_v26 }
  0x58   :  { %444 = vmatprep.subr.bf16.mxu0 %v578_v0 }
  0x5b   :  { %445 = vmatpush3.bf16.msra.mxu0 %v476_v27 }
 0x110   :  { %v147_v19 = vpop.f32.mrb[0].mxu0 }
 0x111   :  { %v148_v20 = vadd.f32 %v363_v18, %v147_v19  ;;  %v408_v21 = vpop.f32.mrb[1].mxu0 }
 0x112   :  { %v150_v22 = vpop.f32.mrb[2].mxu0 }
 0x113   :  { %v153_v23 = vmax.f32 %v148_v20, 0.0  ;;  %v409_v24 = vpop.f32.mrb[3].mxu0 }
 0x115   :  { %v154_v25 = vpack.c.bf16 %v153_v23, %v153_v23 }
 0x117   :  { %427 = vmatmul.mubr.bf16.vlgmr.msra.gmra.mrb[0].mxu1 %v154_v25 }
 0x1ea   :  { %v243_v29 = vpop.f32.mrb[0].mxu1 }
 0x1eb   :  { %v244_v30 = vadd.f32 %v366_v28, %v243_v29  ;;  %v428_v31 = vpop.f32.mrb[1].mxu1 }
 0x1ec   :  { %v246_v32 = vpop.f32.mrb[2].mxu1 }
 0x1ed   :  { %v249_v33 = vmax.f32 %v244_v30, 0.0  ;;  %v429_v34 = vpop.f32.mrb[3].mxu1 }
 0x1ef   :  { %v250_v35 = vpack.c.bf16 %v249_v33, %v249_v33 }
 0x1f1   :  { %447 = vmatmul.mubr.bf16.vlgmr.msra.gmra.mrb[4].mxu0 %v250_v35 }
 0x2c4   :  { %v339_v37 = vpop.f32.mrb[4].mxu0 }
 0x2c5   :  { %v340_v38 = vadd.f32 %v375_v36, %v339_v37  ;;  %v448_v39 = vpop.f32.mrb[5].mxu0 }
 0x2c6   :  { %v342_v40 = vpop.f32.mrb[6].mxu0 }
 0x2c7   :  { %v449_v41 = vpop.f32.mrb[7].mxu0  ;;  %346 = vst.msk [vmem:[#allocation8] sm:$0xff] %vm345_vm2, %v340_v38 }
 0x2c8   :  { %554 = shalt.err (!%p551_p0)
}
 0x2c9   :  { %s555_s3 = scalar_lea.hbm %s687_s4, 128 }
 0x2ca   :  { %p556_p1 = scmp.ne.s32.totalorder %s687_s4, %s555_s3  ;;  %p559_p2 = scmp.lt.u32.totalorder %s555_s3, %s687_s4 }
 0x2cc   :  { %p561_p3 = pnand %p559_p2, %p556_p1 }
 0x2ce   :  { %564 = shalt.err (!%p561_p3)
}
 0x2cf   :  { %356 = dma.vmem_to_hbm [thread:$0]  %s354_s7, 128, %s687_s4, [#allocation4]  }
 0x2d0   :  { %569 = dma.done.wait [#allocation4], 128  }
 0x2d1   :  { %570 = vsyncadd [#allocation4], 4294967168 }
 0x2d2   :  { %360 = vsyncpa [#allocation3], 1 }
 0x2d3   :  { %361 = vsyncpa [#allocation6], 1 }
 0x2d4   :  { %362 = vsyncpa [#allocation4], 1 }

</bundles_post_ra>
